<compile_context>
chip_gen: v5e
topology: v5e:2x2
jax: 0.10.0
libtpu: 0.0.40
codegen_flags: <defaults>
</compile_context>

<pallas_src>
import functools

import jax
import jax.numpy as jnp
from jax import lax
from jax.experimental import pallas as pl
from jax.experimental.pallas import tpu as pltpu


def _resblock_kernel(xq_ref, w1q_ref, b1_ref, wd_ref, bd_ref, w2_ref, b2_ref,
                     out_ref, hpad_ref, *, Ho, Wo, Cin, Cout):
    """One batch element per grid step.

    xq_ref   : (Ho+1, Wo+1, 4*Cin) f32   parity-packed, zero-padded input
    w1q_ref  : (2, 2, 4*Cin, Cout) bf16  conv1 weights regrouped per parity window
    wd_ref   : (Cin, Cout)         bf16  1x1 downsample weights
    w2_ref   : (3, 3, Cout, Cout)  bf16  conv2 weights (HWIO)
    b*_ref   : (1, Cout)           f32   biases
    out_ref  : (Ho*Wo, Cout)       f32   flattened output rows
    hpad_ref : (Ho+2, Wo+2, Cout)  f32   zero-bordered conv2 input scratch
    """
    M = Ho * Wo

    # ---- conv1 (3x3, stride 2, pad 1) as 4 matmuls with K = 4*Cin --------------
    # Stride-2 decimation was folded into channels in the wrapper, so each of the
    # four (a, b) windows is a plain unit-stride slice (no strided loads, no
    # in-kernel gather/concat).
    acc1 = jnp.zeros((M, Cout), jnp.float32)
    identity = None
    for a in range(2):
        for b in range(2):
            win = xq_ref[a:a + Ho, b:b + Wo, :]                 # (Ho, Wo, 4*Cin)
            win2d = win.reshape(M, 4 * Cin)
            acc1 += jnp.dot(win2d.astype(jnp.bfloat16), w1q_ref[a, b],
                            preferred_element_type=jnp.float32)
            if a == 0 and b == 0:
                # downsample (1x1, stride 2): its input is exactly the
                # (hp=1, wp=1) channel block of window (0, 0) -> reuse the slice.
                ctr = win2d[:, 3 * Cin:4 * Cin].astype(jnp.bfloat16)
                identity = jnp.dot(ctr, wd_ref[...],
                                   preferred_element_type=jnp.float32)
    identity = identity + bd_ref[...]
    h = jnp.maximum(acc1 + b1_ref[...], 0.0)                    # f32 ReLU (VPU)

    # ---- stage h into a zero-bordered scratch for conv2 ------------------------
    # Only the 1-wide border is (re)zeroed; the interior is fully overwritten.
    # Re-zeroing every step keeps this correct when the "parallel" grid axis is
    # sharded across TensorCores (scratch buffers are per-core).
    zrow = jnp.zeros((1, Wo + 2, Cout), jnp.float32)
    zcol = jnp.zeros((Ho + 2, 1, Cout), jnp.float32)
    hpad_ref[0:1, :, :] = zrow
    hpad_ref[Ho + 1:Ho + 2, :, :] = zrow
    hpad_ref[:, 0:1, :] = zcol
    hpad_ref[:, Wo + 1:Wo + 2, :] = zcol
    hpad_ref[1:Ho + 1, 1:Wo + 1, :] = h.reshape(Ho, Wo, Cout)

    # ---- conv2 (3x3, stride 1, pad 1): 9 matmuls with K = Cout -----------------
    acc2 = jnp.zeros((M, Cout), jnp.float32)
    for kh in range(3):
        for kw in range(3):
            patch = hpad_ref[kh:kh + Ho, kw:kw + Wo, :]         # (Ho, Wo, Cout)
            acc2 += jnp.dot(patch.reshape(M, Cout).astype(jnp.bfloat16),
                            w2_ref[kh, kw],
                            preferred_element_type=jnp.float32)
    acc2 = acc2 + b2_ref[...]

    # ---- residual add + ReLU (f32 VPU) -----------------------------------------
    out_ref[...] = jnp.maximum(acc2 + identity, 0.0).astype(out_ref.dtype)


def resblock_forward(x_nchw, w1, b1, wd, bd, w2, b2):
    """x_nchw: (N, Cin, H, W).  w1,w2: HWIO (3,3,I,O).  wd: (Cin, Cout). Returns NCHW."""
    N, Cin, H, W = x_nchw.shape
    Cout = w1.shape[-1]
    Ho = (H - 1) // 2 + 1          # conv1 output size (k=3, s=2, p=1)
    Wo = (W - 1) // 2 + 1

    # --- glue (single XLA relayout pass): NCHW->NHWC, pad-1, parity-pack --------
    # xq[n, i, j, hp*2*Cin + wp*Cin + c] == xpad[n, 2*i+hp, 2*j+wp, c]
    x = jnp.transpose(x_nchw, (0, 2, 3, 1)).astype(jnp.float32)      # (N, H, W, Cin)
    Hp, Wp = 2 * (Ho + 1), 2 * (Wo + 1)
    xp = jnp.pad(x, ((0, 0), (1, Hp - H - 1), (1, Wp - W - 1), (0, 0)))
    xq = xp.reshape(N, Ho + 1, 2, Wo + 1, 2, Cin)
    xq = jnp.transpose(xq, (0, 1, 3, 2, 4, 5)).reshape(N, Ho + 1, Wo + 1, 4 * Cin)

    # conv1 weights regrouped into the 4 parity windows: w1q[a, b, (hp,wp,ci), co]
    w1q = jnp.zeros((2, 2, 2, 2, Cin, Cout), jnp.float32)
    for kh in range(3):
        for kw in range(3):
            w1q = w1q.at[kh // 2, kw // 2, kh % 2, kw % 2].set(w1[kh, kw])
    w1q = w1q.reshape(2, 2, 4 * Cin, Cout).astype(jnp.bfloat16)
    wd_b = wd.astype(jnp.bfloat16)
    w2_b = w2.astype(jnp.bfloat16)
    b1_r = b1.reshape(1, Cout).astype(jnp.float32)
    bd_r = bd.reshape(1, Cout).astype(jnp.float32)
    b2_r = b2.reshape(1, Cout).astype(jnp.float32)

    kernel = functools.partial(_resblock_kernel, Ho=Ho, Wo=Wo, Cin=Cin, Cout=Cout)

    def const(shape):
        return pl.BlockSpec(shape, lambda n: (0,) * len(shape))

    # TODO(synk): for very large spatial extents, additionally tile Ho (with a
    # 1-row halo) so per-step VMEM stays bounded on v7x's 64 MiB.
    out_flat = pl.pallas_call(
        kernel,
        grid=(N,),
        in_specs=[
            pl.BlockSpec((None, Ho + 1, Wo + 1, 4 * Cin), lambda n: (n, 0, 0, 0)),
            const((2, 2, 4 * Cin, Cout)),
            const((1, Cout)),
            const((Cin, Cout)),
            const((1, Cout)),
            const((3, 3, Cout, Cout)),
            const((1, Cout)),
        ],
        out_specs=pl.BlockSpec((None, Ho * Wo, Cout), lambda n: (n, 0, 0)),
        out_shape=jax.ShapeDtypeStruct((N, Ho * Wo, Cout), jnp.float32),
        scratch_shapes=[pltpu.VMEM((Ho + 2, Wo + 2, Cout), jnp.float32)],
        compiler_params=pltpu.CompilerParams(
            dimension_semantics=("parallel",),
            vmem_limit_bytes=32 * 1024 * 1024),
    )(xq, w1q, b1_r, wd_b, bd_r, w2_b, b2_r)

    out_nhwc = out_flat.reshape(N, Ho, Wo, Cout)
    return jnp.transpose(out_nhwc, (0, 3, 1, 2))                     # back to NCHW


def _reference(x_nchw, w1, b1, wd, bd, w2, b2):
    """Pure-JAX f32 reference matching the PyTorch ResBlock forward."""
    x = jnp.transpose(x_nchw, (0, 2, 3, 1)).astype(jnp.float32)
    dn = ('NHWC', 'HWIO', 'NHWC')

    def conv(y, w, b, stride, pad):
        out = lax.conv_general_dilated(y, w, (stride, stride),
                                       ((pad, pad), (pad, pad)),
                                       dimension_numbers=dn)
        return out + b.reshape(1, 1, 1, -1)

    out = conv(x, w1, b1, 2, 1)
    identity = conv(x, wd.reshape(1, 1, *wd.shape), bd, 2, 0)
    out = jnp.maximum(out, 0.0)
    out = conv(out, w2, b2, 1, 1)
    out = jnp.maximum(out + identity, 0.0)
    return jnp.transpose(out, (0, 3, 1, 2))


def _init_params(key, inplanes, planes):
    ks = jax.random.split(key, 6)

    def u(k, shape, fan_in):
        bound = 1.0 / jnp.sqrt(fan_in)
        return jax.random.uniform(k, shape, jnp.float32, -bound, bound)

    w1 = u(ks[0], (3, 3, inplanes, planes), 9 * inplanes)   # conv1 (HWIO)
    b1 = u(ks[1], (planes,), 9 * inplanes)
    wd = u(ks[2], (inplanes, planes), inplanes)              # downsample 1x1
    bd = u(ks[3], (planes,), inplanes)
    w2 = u(ks[4], (3, 3, planes, planes), 9 * planes)        # conv2 (HWIO)
    b2 = u(ks[5], (planes,), 9 * planes)
    return w1, b1, wd, bd, w2, b2


if __name__ == "__main__":
    key = jax.random.PRNGKey(0)
    kx, kp = jax.random.split(key)

    N, inplanes, planes, H, W = 2, 4, 8, 16, 16
    x = jax.random.normal(kx, (N, inplanes, H, W), jnp.float32)
    params = _init_params(kp, inplanes, planes)

    out = resblock_forward(x, *params)
    out = jax.block_until_ready(out)

    ref = jax.block_until_ready(_reference(x, *params))
    assert out.shape == (N, planes, H // 2, W // 2), out.shape
    # bf16 MXU inputs with f32 accumulation -> loosened tolerance vs f32 reference.
    assert jnp.allclose(out, ref, atol=2e-2, rtol=2e-2), \
        float(jnp.max(jnp.abs(out - ref)))

    print("KERNEL_OK")
</pallas_src>

<mosaic_0001>
module attributes {stable_mosaic.version = 11 : i64} {
  func.func @_resblock_kernel(%arg0: i32, %arg1: memref<1x9x9x16xf32, #tpu.memory_space<vmem>>, %arg2: memref<2x2x16x8xbf16, #tpu.memory_space<vmem>>, %arg3: memref<1x8xf32, #tpu.memory_space<vmem>>, %arg4: memref<4x8xbf16, #tpu.memory_space<vmem>>, %arg5: memref<1x8xf32, #tpu.memory_space<vmem>>, %arg6: memref<3x3x8x8xbf16, #tpu.memory_space<vmem>>, %arg7: memref<1x8xf32, #tpu.memory_space<vmem>>, %arg8: memref<1x64x8xf32, #tpu.memory_space<vmem>>, %arg9: memref<10x10x8xf32, #tpu.memory_space<vmem>>) attributes {dimension_semantics = [#tpu.dimension_semantics<parallel>], iteration_bounds = array<i64: 2>, scalar_prefetch = 0 : i64, scratch_operands = 1 : i64, tpu.core_type = #tpu.core_type<tc>, window_params = [{transform_indices = @transform_0, window_bounds = array<i64: 1, 9, 9, 16>}, {pipeline_mode = #tpu.pipeline_mode<synchronous>, transform_indices = @transform_1, window_bounds = array<i64: 2, 2, 16, 8>}, {pipeline_mode = #tpu.pipeline_mode<synchronous>, transform_indices = @transform_2, window_bounds = array<i64: 1, 8>}, {pipeline_mode = #tpu.pipeline_mode<synchronous>, transform_indices = @transform_3, window_bounds = array<i64: 4, 8>}, {pipeline_mode = #tpu.pipeline_mode<synchronous>, transform_indices = @transform_4, window_bounds = array<i64: 1, 8>}, {pipeline_mode = #tpu.pipeline_mode<synchronous>, transform_indices = @transform_5, window_bounds = array<i64: 3, 3, 8, 8>}, {pipeline_mode = #tpu.pipeline_mode<synchronous>, transform_indices = @transform_6, window_bounds = array<i64: 1, 8>}, {transform_indices = @transform_7, window_bounds = array<i64: 1, 64, 8>}]} {
    %cst = arith.constant 0.000000e+00 : f32
    %0 = vector.broadcast %cst : f32 to vector<64x8xf32>
    %c0 = arith.constant 0 : index
    %c0_0 = arith.constant 0 : index
    %c0_1 = arith.constant 0 : index
    %c0_2 = arith.constant 0 : index
    %1 = vector.load %arg1[%c0, %c0_0, %c0_1, %c0_2] : memref<1x9x9x16xf32, #tpu.memory_space<vmem>>, vector<1x8x8x16xf32>
    %2 = vector.shape_cast %1 : vector<1x8x8x16xf32> to vector<8x8x16xf32>
    %3 = vector.shape_cast %2 : vector<8x8x16xf32> to vector<64x16xf32>
    %4 = arith.truncf %3 : vector<64x16xf32> to vector<64x16xbf16>
    %c0_3 = arith.constant 0 : index
    %c0_4 = arith.constant 0 : index
    %c0_5 = arith.constant 0 : index
    %c0_6 = arith.constant 0 : index
    %5 = vector.load %arg2[%c0_3, %c0_4, %c0_5, %c0_6] : memref<2x2x16x8xbf16, #tpu.memory_space<vmem>>, vector<1x1x16x8xbf16>
    %6 = vector.shape_cast %5 : vector<1x1x16x8xbf16> to vector<16x8xbf16>
    %cst_7 = arith.constant dense<0.000000e+00> : vector<64x8xf32>
    %7 = tpu.matmul %4, %6, %cst_7 {dimension_numbers = #tpu.dot_dimension_numbers<[1], [0], [0], [1], [0, 0, 1, 1], [], []>} : vector<64x16xbf16>, vector<16x8xbf16>, vector<64x8xf32> -> vector<64x8xf32>
    %8 = arith.addf %0, %7 : vector<64x8xf32>
    %9 = vector.extract_strided_slice %3 {offsets = [0, 12], sizes = [64, 4], strides = [1, 1]} : vector<64x16xf32> to vector<64x4xf32>
    %10 = arith.truncf %9 : vector<64x4xf32> to vector<64x4xbf16>
    %c0_8 = arith.constant 0 : index
    %c0_9 = arith.constant 0 : index
    %11 = vector.load %arg4[%c0_8, %c0_9] : memref<4x8xbf16, #tpu.memory_space<vmem>>, vector<4x8xbf16>
    %cst_10 = arith.constant dense<0.000000e+00> : vector<64x8xf32>
    %12 = tpu.matmul %10, %11, %cst_10 {dimension_numbers = #tpu.dot_dimension_numbers<[1], [0], [0], [1], [0, 0, 1, 1], [], []>} : vector<64x4xbf16>, vector<4x8xbf16>, vector<64x8xf32> -> vector<64x8xf32>
    %c0_11 = arith.constant 0 : index
    %c0_12 = arith.constant 0 : index
    %c1 = arith.constant 1 : index
    %c0_13 = arith.constant 0 : index
    %13 = vector.load %arg1[%c0_11, %c0_12, %c1, %c0_13] : memref<1x9x9x16xf32, #tpu.memory_space<vmem>>, vector<1x8x8x16xf32>
    %14 = vector.shape_cast %13 : vector<1x8x8x16xf32> to vector<8x8x16xf32>
    %15 = vector.shape_cast %14 : vector<8x8x16xf32> to vector<64x16xf32>
    %16 = arith.truncf %15 : vector<64x16xf32> to vector<64x16xbf16>
    %c0_14 = arith.constant 0 : index
    %c1_15 = arith.constant 1 : index
    %c0_16 = arith.constant 0 : index
    %c0_17 = arith.constant 0 : index
    %17 = vector.load %arg2[%c0_14, %c1_15, %c0_16, %c0_17] : memref<2x2x16x8xbf16, #tpu.memory_space<vmem>>, vector<1x1x16x8xbf16>
    %18 = vector.shape_cast %17 : vector<1x1x16x8xbf16> to vector<16x8xbf16>
    %cst_18 = arith.constant dense<0.000000e+00> : vector<64x8xf32>
    %19 = tpu.matmul %16, %18, %cst_18 {dimension_numbers = #tpu.dot_dimension_numbers<[1], [0], [0], [1], [0, 0, 1, 1], [], []>} : vector<64x16xbf16>, vector<16x8xbf16>, vector<64x8xf32> -> vector<64x8xf32>
    %20 = arith.addf %8, %19 : vector<64x8xf32>
    %c0_19 = arith.constant 0 : index
    %c1_20 = arith.constant 1 : index
    %c0_21 = arith.constant 0 : index
    %c0_22 = arith.constant 0 : index
    %21 = vector.load %arg1[%c0_19, %c1_20, %c0_21, %c0_22] : memref<1x9x9x16xf32, #tpu.memory_space<vmem>>, vector<1x8x8x16xf32>
    %22 = vector.shape_cast %21 : vector<1x8x8x16xf32> to vector<8x8x16xf32>
    %23 = vector.shape_cast %22 : vector<8x8x16xf32> to vector<64x16xf32>
    %24 = arith.truncf %23 : vector<64x16xf32> to vector<64x16xbf16>
    %c1_23 = arith.constant 1 : index
    %c0_24 = arith.constant 0 : index
    %c0_25 = arith.constant 0 : index
    %c0_26 = arith.constant 0 : index
    %25 = vector.load %arg2[%c1_23, %c0_24, %c0_25, %c0_26] : memref<2x2x16x8xbf16, #tpu.memory_space<vmem>>, vector<1x1x16x8xbf16>
    %26 = vector.shape_cast %25 : vector<1x1x16x8xbf16> to vector<16x8xbf16>
    %cst_27 = arith.constant dense<0.000000e+00> : vector<64x8xf32>
    %27 = tpu.matmul %24, %26, %cst_27 {dimension_numbers = #tpu.dot_dimension_numbers<[1], [0], [0], [1], [0, 0, 1, 1], [], []>} : vector<64x16xbf16>, vector<16x8xbf16>, vector<64x8xf32> -> vector<64x8xf32>
    %28 = arith.addf %20, %27 : vector<64x8xf32>
    %c0_28 = arith.constant 0 : index
    %c1_29 = arith.constant 1 : index
    %c1_30 = arith.constant 1 : index
    %c0_31 = arith.constant 0 : index
    %29 = vector.load %arg1[%c0_28, %c1_29, %c1_30, %c0_31] : memref<1x9x9x16xf32, #tpu.memory_space<vmem>>, vector<1x8x8x16xf32>
    %30 = vector.shape_cast %29 : vector<1x8x8x16xf32> to vector<8x8x16xf32>
    %31 = vector.shape_cast %30 : vector<8x8x16xf32> to vector<64x16xf32>
    %32 = arith.truncf %31 : vector<64x16xf32> to vector<64x16xbf16>
    %c1_32 = arith.constant 1 : index
    %c1_33 = arith.constant 1 : index
    %c0_34 = arith.constant 0 : index
    %c0_35 = arith.constant 0 : index
    %33 = vector.load %arg2[%c1_32, %c1_33, %c0_34, %c0_35] : memref<2x2x16x8xbf16, #tpu.memory_space<vmem>>, vector<1x1x16x8xbf16>
    %34 = vector.shape_cast %33 : vector<1x1x16x8xbf16> to vector<16x8xbf16>
    %cst_36 = arith.constant dense<0.000000e+00> : vector<64x8xf32>
    %35 = tpu.matmul %32, %34, %cst_36 {dimension_numbers = #tpu.dot_dimension_numbers<[1], [0], [0], [1], [0, 0, 1, 1], [], []>} : vector<64x16xbf16>, vector<16x8xbf16>, vector<64x8xf32> -> vector<64x8xf32>
    %36 = arith.addf %28, %35 : vector<64x8xf32>
    %c0_37 = arith.constant 0 : index
    %c0_38 = arith.constant 0 : index
    %37 = vector.load %arg5[%c0_37, %c0_38] : memref<1x8xf32, #tpu.memory_space<vmem>>, vector<1x8xf32>
    %38 = vector.broadcast %37 : vector<1x8xf32> to vector<64x8xf32>
    %39 = arith.addf %12, %38 : vector<64x8xf32>
    %c0_39 = arith.constant 0 : index
    %c0_40 = arith.constant 0 : index
    %40 = vector.load %arg3[%c0_39, %c0_40] : memref<1x8xf32, #tpu.memory_space<vmem>>, vector<1x8xf32>
    %41 = vector.broadcast %40 : vector<1x8xf32> to vector<64x8xf32>
    %42 = arith.addf %36, %41 : vector<64x8xf32>
    %cst_41 = arith.constant 0.000000e+00 : f32
    %43 = vector.broadcast %cst_41 : f32 to vector<64x8xf32>
    %44 = arith.maximumf %42, %43 : vector<64x8xf32>
    %cst_42 = arith.constant 0.000000e+00 : f32
    %45 = vector.broadcast %cst_42 : f32 to vector<1x10x8xf32>
    %cst_43 = arith.constant 0.000000e+00 : f32
    %46 = vector.broadcast %cst_43 : f32 to vector<10x1x8xf32>
    %c0_44 = arith.constant 0 : index
    %c0_45 = arith.constant 0 : index
    %c0_46 = arith.constant 0 : index
    %47 = vector.load %arg9[%c0_44, %c0_45, %c0_46] : memref<10x10x8xf32, #tpu.memory_space<vmem>>, vector<1x10x8xf32>
    tpu.vector_store %arg9[%c0_44, %c0_45, %c0_46], %45 {strides = array<i32>} : memref<10x10x8xf32, #tpu.memory_space<vmem>>, vector<1x10x8xf32>,
    %c9 = arith.constant 9 : index
    %c0_47 = arith.constant 0 : index
    %c0_48 = arith.constant 0 : index
    %48 = vector.load %arg9[%c9, %c0_47, %c0_48] : memref<10x10x8xf32, #tpu.memory_space<vmem>>, vector<1x10x8xf32>
    tpu.vector_store %arg9[%c9, %c0_47, %c0_48], %45 {strides = array<i32>} : memref<10x10x8xf32, #tpu.memory_space<vmem>>, vector<1x10x8xf32>,
    %c0_49 = arith.constant 0 : index
    %c0_50 = arith.constant 0 : index
    %c0_51 = arith.constant 0 : index
    %49 = vector.load %arg9[%c0_49, %c0_50, %c0_51] : memref<10x10x8xf32, #tpu.memory_space<vmem>>, vector<10x1x8xf32>
    tpu.vector_store %arg9[%c0_49, %c0_50, %c0_51], %46 {strides = array<i32>} : memref<10x10x8xf32, #tpu.memory_space<vmem>>, vector<10x1x8xf32>,
    %c0_52 = arith.constant 0 : index
    %c9_53 = arith.constant 9 : index
    %c0_54 = arith.constant 0 : index
    %50 = vector.load %arg9[%c0_52, %c9_53, %c0_54] : memref<10x10x8xf32, #tpu.memory_space<vmem>>, vector<10x1x8xf32>
    tpu.vector_store %arg9[%c0_52, %c9_53, %c0_54], %46 {strides = array<i32>} : memref<10x10x8xf32, #tpu.memory_space<vmem>>, vector<10x1x8xf32>,
    %51 = vector.shape_cast %44 : vector<64x8xf32> to vector<8x8x8xf32>
    %c1_55 = arith.constant 1 : index
    %c1_56 = arith.constant 1 : index
    %c0_57 = arith.constant 0 : index
    %52 = vector.load %arg9[%c1_55, %c1_56, %c0_57] : memref<10x10x8xf32, #tpu.memory_space<vmem>>, vector<8x8x8xf32>
    tpu.vector_store %arg9[%c1_55, %c1_56, %c0_57], %51 {strides = array<i32>} : memref<10x10x8xf32, #tpu.memory_space<vmem>>, vector<8x8x8xf32>,
    %cst_58 = arith.constant 0.000000e+00 : f32
    %53 = vector.broadcast %cst_58 : f32 to vector<64x8xf32>
    %c0_59 = arith.constant 0 : index
    %c0_60 = arith.constant 0 : index
    %c0_61 = arith.constant 0 : index
    %54 = vector.load %arg9[%c0_59, %c0_60, %c0_61] : memref<10x10x8xf32, #tpu.memory_space<vmem>>, vector<8x8x8xf32>
    %55 = vector.shape_cast %54 : vector<8x8x8xf32> to vector<64x8xf32>
    %56 = arith.truncf %55 : vector<64x8xf32> to vector<64x8xbf16>
    %c0_62 = arith.constant 0 : index
    %c0_63 = arith.constant 0 : index
    %c0_64 = arith.constant 0 : index
    %c0_65 = arith.constant 0 : index
    %57 = vector.load %arg6[%c0_62, %c0_63, %c0_64, %c0_65] : memref<3x3x8x8xbf16, #tpu.memory_space<vmem>>, vector<1x1x8x8xbf16>
    %58 = vector.shape_cast %57 : vector<1x1x8x8xbf16> to vector<8x8xbf16>
    %cst_66 = arith.constant dense<0.000000e+00> : vector<64x8xf32>
    %59 = tpu.matmul %56, %58, %cst_66 {dimension_numbers = #tpu.dot_dimension_numbers<[1], [0], [0], [1], [0, 0, 1, 1], [], []>} : vector<64x8xbf16>, vector<8x8xbf16>, vector<64x8xf32> -> vector<64x8xf32>
    %60 = arith.addf %53, %59 : vector<64x8xf32>
    %c0_67 = arith.constant 0 : index
    %c1_68 = arith.constant 1 : index
    %c0_69 = arith.constant 0 : index
    %61 = vector.load %arg9[%c0_67, %c1_68, %c0_69] : memref<10x10x8xf32, #tpu.memory_space<vmem>>, vector<8x8x8xf32>
    %62 = vector.shape_cast %61 : vector<8x8x8xf32> to vector<64x8xf32>
    %63 = arith.truncf %62 : vector<64x8xf32> to vector<64x8xbf16>
    %c0_70 = arith.constant 0 : index
    %c1_71 = arith.constant 1 : index
    %c0_72 = arith.constant 0 : index
    %c0_73 = arith.constant 0 : index
    %64 = vector.load %arg6[%c0_70, %c1_71, %c0_72, %c0_73] : memref<3x3x8x8xbf16, #tpu.memory_space<vmem>>, vector<1x1x8x8xbf16>
    %65 = vector.shape_cast %64 : vector<1x1x8x8xbf16> to vector<8x8xbf16>
    %cst_74 = arith.constant dense<0.000000e+00> : vector<64x8xf32>
    %66 = tpu.matmul %63, %65, %cst_74 {dimension_numbers = #tpu.dot_dimension_numbers<[1], [0], [0], [1], [0, 0, 1, 1], [], []>} : vector<64x8xbf16>, vector<8x8xbf16>, vector<64x8xf32> -> vector<64x8xf32>
    %67 = arith.addf %60, %66 : vector<64x8xf32>
    %c0_75 = arith.constant 0 : index
    %c2 = arith.constant 2 : index
    %c0_76 = arith.constant 0 : index
    %68 = vector.load %arg9[%c0_75, %c2, %c0_76] : memref<10x10x8xf32, #tpu.memory_space<vmem>>, vector<8x8x8xf32>
    %69 = vector.shape_cast %68 : vector<8x8x8xf32> to vector<64x8xf32>
    %70 = arith.truncf %69 : vector<64x8xf32> to vector<64x8xbf16>
    %c0_77 = arith.constant 0 : index
    %c2_78 = arith.constant 2 : index
    %c0_79 = arith.constant 0 : index
    %c0_80 = arith.constant 0 : index
    %71 = vector.load %arg6[%c0_77, %c2_78, %c0_79, %c0_80] : memref<3x3x8x8xbf16, #tpu.memory_space<vmem>>, vector<1x1x8x8xbf16>
    %72 = vector.shape_cast %71 : vector<1x1x8x8xbf16> to vector<8x8xbf16>
    %cst_81 = arith.constant dense<0.000000e+00> : vector<64x8xf32>
    %73 = tpu.matmul %70, %72, %cst_81 {dimension_numbers = #tpu.dot_dimension_numbers<[1], [0], [0], [1], [0, 0, 1, 1], [], []>} : vector<64x8xbf16>, vector<8x8xbf16>, vector<64x8xf32> -> vector<64x8xf32>
    %74 = arith.addf %67, %73 : vector<64x8xf32>
    %c1_82 = arith.constant 1 : index
    %c0_83 = arith.constant 0 : index
    %c0_84 = arith.constant 0 : index
    %75 = vector.load %arg9[%c1_82, %c0_83, %c0_84] : memref<10x10x8xf32, #tpu.memory_space<vmem>>, vector<8x8x8xf32>
    %76 = vector.shape_cast %75 : vector<8x8x8xf32> to vector<64x8xf32>
    %77 = arith.truncf %76 : vector<64x8xf32> to vector<64x8xbf16>
    %c1_85 = arith.constant 1 : index
    %c0_86 = arith.constant 0 : index
    %c0_87 = arith.constant 0 : index
    %c0_88 = arith.constant 0 : index
    %78 = vector.load %arg6[%c1_85, %c0_86, %c0_87, %c0_88] : memref<3x3x8x8xbf16, #tpu.memory_space<vmem>>, vector<1x1x8x8xbf16>
    %79 = vector.shape_cast %78 : vector<1x1x8x8xbf16> to vector<8x8xbf16>
    %cst_89 = arith.constant dense<0.000000e+00> : vector<64x8xf32>
    %80 = tpu.matmul %77, %79, %cst_89 {dimension_numbers = #tpu.dot_dimension_numbers<[1], [0], [0], [1], [0, 0, 1, 1], [], []>} : vector<64x8xbf16>, vector<8x8xbf16>, vector<64x8xf32> -> vector<64x8xf32>
    %81 = arith.addf %74, %80 : vector<64x8xf32>
    %c1_90 = arith.constant 1 : index
    %c1_91 = arith.constant 1 : index
    %c0_92 = arith.constant 0 : index
    %82 = vector.load %arg9[%c1_90, %c1_91, %c0_92] : memref<10x10x8xf32, #tpu.memory_space<vmem>>, vector<8x8x8xf32>
    %83 = vector.shape_cast %82 : vector<8x8x8xf32> to vector<64x8xf32>
    %84 = arith.truncf %83 : vector<64x8xf32> to vector<64x8xbf16>
    %c1_93 = arith.constant 1 : index
    %c1_94 = arith.constant 1 : index
    %c0_95 = arith.constant 0 : index
    %c0_96 = arith.constant 0 : index
    %85 = vector.load %arg6[%c1_93, %c1_94, %c0_95, %c0_96] : memref<3x3x8x8xbf16, #tpu.memory_space<vmem>>, vector<1x1x8x8xbf16>
    %86 = vector.shape_cast %85 : vector<1x1x8x8xbf16> to vector<8x8xbf16>
    %cst_97 = arith.constant dense<0.000000e+00> : vector<64x8xf32>
    %87 = tpu.matmul %84, %86, %cst_97 {dimension_numbers = #tpu.dot_dimension_numbers<[1], [0], [0], [1], [0, 0, 1, 1], [], []>} : vector<64x8xbf16>, vector<8x8xbf16>, vector<64x8xf32> -> vector<64x8xf32>
    %88 = arith.addf %81, %87 : vector<64x8xf32>
    %c1_98 = arith.constant 1 : index
    %c2_99 = arith.constant 2 : index
    %c0_100 = arith.constant 0 : index
    %89 = vector.load %arg9[%c1_98, %c2_99, %c0_100] : memref<10x10x8xf32, #tpu.memory_space<vmem>>, vector<8x8x8xf32>
    %90 = vector.shape_cast %89 : vector<8x8x8xf32> to vector<64x8xf32>
    %91 = arith.truncf %90 : vector<64x8xf32> to vector<64x8xbf16>
    %c1_101 = arith.constant 1 : index
    %c2_102 = arith.constant 2 : index
    %c0_103 = arith.constant 0 : index
    %c0_104 = arith.constant 0 : index
    %92 = vector.load %arg6[%c1_101, %c2_102, %c0_103, %c0_104] : memref<3x3x8x8xbf16, #tpu.memory_space<vmem>>, vector<1x1x8x8xbf16>
    %93 = vector.shape_cast %92 : vector<1x1x8x8xbf16> to vector<8x8xbf16>
    %cst_105 = arith.constant dense<0.000000e+00> : vector<64x8xf32>
    %94 = tpu.matmul %91, %93, %cst_105 {dimension_numbers = #tpu.dot_dimension_numbers<[1], [0], [0], [1], [0, 0, 1, 1], [], []>} : vector<64x8xbf16>, vector<8x8xbf16>, vector<64x8xf32> -> vector<64x8xf32>
    %95 = arith.addf %88, %94 : vector<64x8xf32>
    %c2_106 = arith.constant 2 : index
    %c0_107 = arith.constant 0 : index
    %c0_108 = arith.constant 0 : index
    %96 = vector.load %arg9[%c2_106, %c0_107, %c0_108] : memref<10x10x8xf32, #tpu.memory_space<vmem>>, vector<8x8x8xf32>
    %97 = vector.shape_cast %96 : vector<8x8x8xf32> to vector<64x8xf32>
    %98 = arith.truncf %97 : vector<64x8xf32> to vector<64x8xbf16>
    %c2_109 = arith.constant 2 : index
    %c0_110 = arith.constant 0 : index
    %c0_111 = arith.constant 0 : index
    %c0_112 = arith.constant 0 : index
    %99 = vector.load %arg6[%c2_109, %c0_110, %c0_111, %c0_112] : memref<3x3x8x8xbf16, #tpu.memory_space<vmem>>, vector<1x1x8x8xbf16>
    %100 = vector.shape_cast %99 : vector<1x1x8x8xbf16> to vector<8x8xbf16>
    %cst_113 = arith.constant dense<0.000000e+00> : vector<64x8xf32>
    %101 = tpu.matmul %98, %100, %cst_113 {dimension_numbers = #tpu.dot_dimension_numbers<[1], [0], [0], [1], [0, 0, 1, 1], [], []>} : vector<64x8xbf16>, vector<8x8xbf16>, vector<64x8xf32> -> vector<64x8xf32>
    %102 = arith.addf %95, %101 : vector<64x8xf32>
    %c2_114 = arith.constant 2 : index
    %c1_115 = arith.constant 1 : index
    %c0_116 = arith.constant 0 : index
    %103 = vector.load %arg9[%c2_114, %c1_115, %c0_116] : memref<10x10x8xf32, #tpu.memory_space<vmem>>, vector<8x8x8xf32>
    %104 = vector.shape_cast %103 : vector<8x8x8xf32> to vector<64x8xf32>
    %105 = arith.truncf %104 : vector<64x8xf32> to vector<64x8xbf16>
    %c2_117 = arith.constant 2 : index
    %c1_118 = arith.constant 1 : index
    %c0_119 = arith.constant 0 : index
    %c0_120 = arith.constant 0 : index
    %106 = vector.load %arg6[%c2_117, %c1_118, %c0_119, %c0_120] : memref<3x3x8x8xbf16, #tpu.memory_space<vmem>>, vector<1x1x8x8xbf16>
    %107 = vector.shape_cast %106 : vector<1x1x8x8xbf16> to vector<8x8xbf16>
    %cst_121 = arith.constant dense<0.000000e+00> : vector<64x8xf32>
    %108 = tpu.matmul %105, %107, %cst_121 {dimension_numbers = #tpu.dot_dimension_numbers<[1], [0], [0], [1], [0, 0, 1, 1], [], []>} : vector<64x8xbf16>, vector<8x8xbf16>, vector<64x8xf32> -> vector<64x8xf32>
    %109 = arith.addf %102, %108 : vector<64x8xf32>
    %c2_122 = arith.constant 2 : index
    %c2_123 = arith.constant 2 : index
    %c0_124 = arith.constant 0 : index
    %110 = vector.load %arg9[%c2_122, %c2_123, %c0_124] : memref<10x10x8xf32, #tpu.memory_space<vmem>>, vector<8x8x8xf32>
    %111 = vector.shape_cast %110 : vector<8x8x8xf32> to vector<64x8xf32>
    %112 = arith.truncf %111 : vector<64x8xf32> to vector<64x8xbf16>
    %c2_125 = arith.constant 2 : index
    %c2_126 = arith.constant 2 : index
    %c0_127 = arith.constant 0 : index
    %c0_128 = arith.constant 0 : index
    %113 = vector.load %arg6[%c2_125, %c2_126, %c0_127, %c0_128] : memref<3x3x8x8xbf16, #tpu.memory_space<vmem>>, vector<1x1x8x8xbf16>
    %114 = vector.shape_cast %113 : vector<1x1x8x8xbf16> to vector<8x8xbf16>
    %cst_129 = arith.constant dense<0.000000e+00> : vector<64x8xf32>
    %115 = tpu.matmul %112, %114, %cst_129 {dimension_numbers = #tpu.dot_dimension_numbers<[1], [0], [0], [1], [0, 0, 1, 1], [], []>} : vector<64x8xbf16>, vector<8x8xbf16>, vector<64x8xf32> -> vector<64x8xf32>
    %116 = arith.addf %109, %115 : vector<64x8xf32>
    %c0_130 = arith.constant 0 : index
    %c0_131 = arith.constant 0 : index
    %117 = vector.load %arg7[%c0_130, %c0_131] : memref<1x8xf32, #tpu.memory_space<vmem>>, vector<1x8xf32>
    %118 = vector.broadcast %117 : vector<1x8xf32> to vector<64x8xf32>
    %119 = arith.addf %116, %118 : vector<64x8xf32>
    %120 = arith.addf %119, %39 : vector<64x8xf32>
    %cst_132 = arith.constant 0.000000e+00 : f32
    %121 = vector.broadcast %cst_132 : f32 to vector<64x8xf32>
    %122 = arith.maximumf %120, %121 : vector<64x8xf32>
    %c0_133 = arith.constant 0 : index
    %c0_134 = arith.constant 0 : index
    %c0_135 = arith.constant 0 : index
    %123 = vector.load %arg8[%c0_133, %c0_134, %c0_135] : memref<1x64x8xf32, #tpu.memory_space<vmem>>, vector<1x64x8xf32>
    %124 = vector.shape_cast %123 : vector<1x64x8xf32> to vector<64x8xf32>
    %125 = vector.shape_cast %122 : vector<64x8xf32> to vector<1x64x8xf32>
    tpu.vector_store %arg8[%c0_133, %c0_134, %c0_135], %125 {strides = array<i32>} : memref<1x64x8xf32, #tpu.memory_space<vmem>>, vector<1x64x8xf32>,
    return
  }
  func.func @transform_0(%arg0: i32) -> (i32, i32, i32, i32) {
    %c0_i32 = arith.constant 0 : i32
    %c0_i32_0 = arith.constant 0 : i32
    %c0_i32_1 = arith.constant 0 : i32
    %c0_i32_2 = arith.constant 0 : i32
    return %arg0, %c0_i32, %c0_i32_0, %c0_i32_1 : i32, i32, i32, i32
  }
  func.func @transform_1(%arg0: i32) -> (i32, i32, i32, i32) {
    %c0_i32 = arith.constant 0 : i32
    %c0_i32_0 = arith.constant 0 : i32
    %c0_i32_1 = arith.constant 0 : i32
    %c0_i32_2 = arith.constant 0 : i32
    %c0_i32_3 = arith.constant 0 : i32
    return %c0_i32, %c0_i32_0, %c0_i32_1, %c0_i32_2 : i32, i32, i32, i32
  }
  func.func @transform_2(%arg0: i32) -> (i32, i32) {
    %c0_i32 = arith.constant 0 : i32
    %c0_i32_0 = arith.constant 0 : i32
    %c0_i32_1 = arith.constant 0 : i32
    return %c0_i32, %c0_i32_0 : i32, i32
  }
  func.func @transform_3(%arg0: i32) -> (i32, i32) {
    %c0_i32 = arith.constant 0 : i32
    %c0_i32_0 = arith.constant 0 : i32
    %c0_i32_1 = arith.constant 0 : i32
    return %c0_i32, %c0_i32_0 : i32, i32
  }
  func.func @transform_4(%arg0: i32) -> (i32, i32) {
    %c0_i32 = arith.constant 0 : i32
    %c0_i32_0 = arith.constant 0 : i32
    %c0_i32_1 = arith.constant 0 : i32
    return %c0_i32, %c0_i32_0 : i32, i32
  }
  func.func @transform_5(%arg0: i32) -> (i32, i32, i32, i32) {
    %c0_i32 = arith.constant 0 : i32
    %c0_i32_0 = arith.constant 0 : i32
    %c0_i32_1 = arith.constant 0 : i32
    %c0_i32_2 = arith.constant 0 : i32
    %c0_i32_3 = arith.constant 0 : i32
    return %c0_i32, %c0_i32_0, %c0_i32_1, %c0_i32_2 : i32, i32, i32, i32
  }
  func.func @transform_6(%arg0: i32) -> (i32, i32) {
    %c0_i32 = arith.constant 0 : i32
    %c0_i32_0 = arith.constant 0 : i32
    %c0_i32_1 = arith.constant 0 : i32
    return %c0_i32, %c0_i32_0 : i32, i32
  }
  func.func @transform_7(%arg0: i32) -> (i32, i32, i32) {
    %c0_i32 = arith.constant 0 : i32
    %c0_i32_0 = arith.constant 0 : i32
    %c0_i32_1 = arith.constant 0 : i32
    return %arg0, %c0_i32, %c0_i32_0 : i32, i32, i32
  }
}

</mosaic_0001>

<bundles_post_ra>
// kernel: tpu_custom_call.1
= control target key start
LH: loop header
LB: loop body
LE: loop exit
PB: predicated region body
PF: predicated region fallthrough
CT: control target
= control target key end

     0   :  { %s1518_s24 = smov 0   ;;  %s1907_s0 = inlined_call_operand.vmem [shape: f32[2,9,9,16], index: 0, kind: input, shape index: {}]   ;;  %s1908_s1 = inlined_call_operand.vmem [shape: bf16[2,2,16,8], index: 1, kind: input, shape index: {}]   ;;  %s1909_s2 = inlined_call_operand.vmem [shape: f32[1,8], index: 2, kind: input, shape index: {}]   ;;  %s1910_s3 = inlined_call_operand.vmem [shape: bf16[4,8], index: 3, kind: input, shape index: {}]   ;;  %s1911_s4 = inlined_call_operand.vmem [shape: f32[1,8], index: 4, kind: input, shape index: {}]   ;;  %s1912_s5 = inlined_call_operand.vmem [shape: bf16[3,3,8,8], index: 5, kind: input, shape index: {}]   ;;  %s1913_s6 = inlined_call_operand.vmem [shape: f32[1,8], index: 6, kind: input, shape index: {}]   ;;  %s1914_s7 = inlined_call_operand.vmem [shape: f32[2,64,8], index: 7, kind: output, shape index: {}]  }
   0x1 LB: > { %s1335_s25 = sadd.s32 4294967295, %s1474_s24   ;;  %p1339_p0 = scmp.ge.s32.totalorder %s1474_s24, 1  ;;  %s1474_s24 = sphi %s1518_s24, %s17_s24  }
   0x2   : > { %p237_p1 = scmp.lt.s32.totalorder %s1474_s24, 3 }
   0x4   : > { %p238_p2 = pnand %p1339_p0, %p237_p1 }
   0x5   : > { %p269_p3 = scmp.lt.s32.totalorder (!%p238_p2), %s1335_s25, 1  ;;  %s1476_s15 = smov (!%p238_p2), 116  }
   0x6   : > { %241 = sbr.rel (%p238_p2) target bundleno = 519 (0x207), region = 48 }
   0xb   : > { %v1449_v0 = vld [vmem:[%s1908_s1 + $0x8] sm:$0xff]  ;;  %v1448_v1 = vld [vmem:[%s1908_s1] sm:$0xff]  ;;  %v1450_v2 = vld [vmem:[%s1908_s1 + $0x10] sm:$0xff]  ;;  %s1916_s25 = smov (!%p269_p3, %s1335_s25), 1  ;;  %vm316_vm0 = vcmask 130048   ;;  %vm575_vm1 = vcmask 1041408  }
   0xc   : > { %v1451_v3 = vld [vmem:[%s1908_s1 + $0x18] sm:$0xff]  ;;  %1452 = vmatpush.bf16.msra.mxu2 %v1449_v0  ;;  %1453 = vmatpush.bf16.msra.mxu3 %v1448_v1  ;;  %s1454_s11 = smul.u32 144, %s1916_s25  ;;  %v294_v36 = vld [vmem:[%s1910_s3] sm:$0x3]  ;;  %vm562_vm2 = vcmask 31744   ;;  %vm704_vm3 = vcmask 1043456  }
   0xd   : > { %336 = vmatpush.bf16.msra.mxu0 %v1449_v0  ;;  %383 = vmatpush.bf16.msra.mxu1 %v1448_v1  ;;  %v577_v37 = vsel %vm575_vm1, %v294_v36, 0  ;;  %v1401_v41 = vld [vmem:[%s1912_s5 + $0x4] sm:$0xf]  ;;  %vm628_vm4 = vcmask 64512   ;;  %vm630_vm5 = vcmask 58368   ;;  %v1477_v49 = vmov 0.0  }
   0xe   : > { %s1544_s14 = scalar_lea.vmem %s1907_s0, %s1454_s11  ;;  %v706_v42 = vsel %vm704_vm3, %v1401_v41, 0  ;;  %v677_v48 = vld [vmem:[%s1912_s5] sm:$0xf]  ;;  %629 = vst.msk [vmem:[#allocation2] sm:$0xff] %vm628_vm4, %v1477_v49  ;;  %vm635_vm6 = vcmask 57344   ;;  %s1447_s21 = sshll.u32 %s1916_s25, 6 }
   0xf   : > { %v299_v4 = vld [vmem:[%s1544_s14 + $0x41] sm:$0xff]  ;;  %v300_v5 = vld [vmem:[%s1544_s14 + $0x51] sm:$0xff]  ;;  %v750_v50 = vsel %vm704_vm3, %v677_v48, 0  ;;  %631 = vst.msk [vmem:[#allocation2 + $0x8] sm:$0x3] %vm630_vm5, %v1477_v49  ;;  %s1844_s26 = scalar_lea.vmem %s1914_s7, %s1447_s21 }
  0x10   : > { %446 = vmatpush.bf16.msrb.mxu2 %v1450_v2  ;;  %516 = vmatpush.bf16.msrb.mxu3 %v1451_v3  ;;  %v284_v6 = vld [vmem:[%s1544_s14 + $0x40] sm:$0xff]  ;;  %v305_v7 = vpack.c.bf16 %v300_v5, %v299_v4  ;;  %v285_v8 = vld [vmem:[%s1544_s14 + $0x50] sm:$0xff]  ;;  %636 = vst.msk [vmem:[#allocation2] sm:$0x1] %vm635_vm6, %v1477_v49  ;;  %v1410_v52 = vld [vmem:[%s1912_s5 + $0x8] sm:$0xf] }
  0x11   : > { %v280_v9 = vld [vmem:[%s1544_s14] sm:$0xff]  ;;  %v281_v10 = vld [vmem:[%s1544_s14 + $0x10] sm:$0xff]  ;;  %v290_v11 = vpack.c.bf16 %v285_v8, %v284_v6  ;;  %586 = vmatpush.bf16.msrb.mxu0 %v577_v37  ;;  %715 = vmatpush.bf16.msrb.mxu1 %v706_v42  ;;  %646 = vst.msk [vmem:[#allocation2 + $0x9] sm:$0x1] %vm635_vm6, %v1477_v49  ;;  %v808_v54 = vsel %vm704_vm3, %v1410_v52, 0 }
  0x12   : > { %v288_v12 = vpack.c.bf16 %v281_v10, %v280_v9  ;;  %1351 = vmatmul.msk.bf16.vlgmr.msra.gmra.mxu2 %vm316_vm0, %v305_v7  ;;  %v295_v13 = vld [vmem:[%s1544_s14 + $0x1] sm:$0xff]  ;;  %v296_v14 = vld [vmem:[%s1544_s14 + $0x11] sm:$0xff]  ;;  %633 = vst.msk [vmem:[#allocation2 + $0x90] sm:$0xff] %vm628_vm4, %v1477_v49  ;;  %v1415_v58 = vld [vmem:[%s1912_s5 + $0xc] sm:$0xf] }
  0x13   : > { %1359 = vmatmul.msk.bf16.vlgmr.msra.gmra.mxu3 %vm316_vm0, %v290_v11  ;;  %v282_v15 = vld [vmem:[%s1544_s14 + $0x20] sm:$0xff]  ;;  %v283_v16 = vld [vmem:[%s1544_s14 + $0x30] sm:$0xff]  ;;  %v303_v17 = vpack.c.bf16 %v296_v14, %v295_v13  ;;  %558 = vrot.lane.b32.xlu1 %v290_v11, %s1476_s15  ;;  %634 = vst.msk [vmem:[#allocation2 + $0x98] sm:$0x3] %vm630_vm5, %v1477_v49  ;;  %v874_v60 = vsel %vm704_vm3, %v1415_v58, 0 }
  0x14   : > { %554 = vrot.lane.b32.xlu0 %v288_v12, %s1476_s15  ;;  %1357 = vmatmul.msk.bf16.vlgmr.msra.gmra.mxu1 %vm316_vm0, %v288_v12  ;;  %v286_v18 = vld [vmem:[%s1544_s14 + $0x60] sm:$0xff]  ;;  %v287_v19 = vld [vmem:[%s1544_s14 + $0x70] sm:$0xff]  ;;  %v289_v20 = vpack.c.bf16 %v283_v16, %v282_v15  ;;  %v414_v28 = vpack.c.bf16 %v282_v15, %v281_v10  ;;  %v415_v32 = vpack.c.bf16 %v284_v6, %v283_v16 }
  0x15   : > { %1349 = vmatmul.msk.bf16.vlgmr.msra.gmra.mxu0 %vm316_vm0, %v303_v17  ;;  %v291_v21 = vpack.c.bf16 %v287_v19, %v286_v18  ;;  %v301_v22 = vld [vmem:[%s1544_s14 + $0x61] sm:$0xff]  ;;  %v302_v23 = vld [vmem:[%s1544_s14 + $0x71] sm:$0xff]  ;;  %v416_v38 = vpack.c.bf16 %v286_v18, %v285_v8  ;;  %759 = vmatpush.bf16.msra.mxu2 %v750_v50  ;;  %637 = vst.msk [vmem:[#allocation2 + $0x10] sm:$0x1] %vm635_vm6, %v1477_v49  ;;  %v1647_v7 = vld [vmem:[%s1909_s2] ss:$0 sm:$0xff] }
  0x16   : > { %v306_v24 = vpack.c.bf16 %v302_v23, %v301_v22  ;;  %v298_v25 = vld [vmem:[%s1544_s14 + $0x31] sm:$0xff]  ;;  %v1380_v26 = vld [vmem:[%s1544_s14 + $0x21] sm:$0xff]  ;;  %v486_v39 = vpack.c.bf16 %v301_v22, %v300_v5  ;;  %638 = vst.msk [vmem:[#allocation2 + $0x20] sm:$0x1] %vm635_vm6, %v1477_v49  ;;  %817 = vmatpush.bf16.msra.mxu3 %v808_v54  ;;  %883 = vmatpush.bf16.msra.mxu0 %v874_v60 }
  0x17   : > { %v304_v27 = vpack.c.bf16 %v298_v25, %v1380_v26  ;;  %v484_v29 = vpack.c.bf16 %v1380_v26, %v296_v14  ;;  %v1368_v30 = vld [vmem:[%s1544_s14 + $0x80] sm:$0xff]  ;;  %v485_v33 = vpack.c.bf16 %v299_v4, %v298_v25  ;;  %639 = vst.msk [vmem:[#allocation2 + $0x30] sm:$0x1] %vm635_vm6, %v1477_v49  ;;  %v1420_v62 = vld [vmem:[%s1912_s5 + $0x10] sm:$0xf] }
  0x18   : > { %v417_v31 = vpack.c.bf16 %v1368_v30, %v287_v19  ;;  %v1386_v34 = vld [vmem:[%s1544_s14 + $0x81] sm:$0xff]  ;;  %640 = vst.msk [vmem:[#allocation2 + $0x40] sm:$0x1] %vm635_vm6, %v1477_v49  ;;  %v940_v63 = vsel %vm704_vm3, %v1420_v62, 0 }
  0x19   : > { %v487_v35 = vpack.c.bf16 %v1386_v34, %v302_v23  ;;  %641 = vst.msk [vmem:[#allocation2 + $0x50] sm:$0x1] %vm635_vm6, %v1477_v49  ;;  %949 = vmatpush.bf16.msra.mxu1 %v940_v63  ;;  %v781_v22 = vld [vmem:[#allocation2 + $0x2] sm:$0xff] }
  0x1a   : > { %642 = vst.msk [vmem:[#allocation2 + $0x60] sm:$0x1] %vm635_vm6, %v1477_v49 }
  0x1b   : > { %560 = vrot.lane.b32.xlu1 %v291_v21, %s1476_s15  ;;  %643 = vst.msk [vmem:[#allocation2 + $0x70] sm:$0x1] %vm635_vm6, %v1477_v49 }
  0x1c   : > { %556 = vrot.lane.b32.xlu0 %v289_v20, %s1476_s15  ;;  %644 = vst.msk [vmem:[#allocation2 + $0x80] sm:$0x1] %vm635_vm6, %v1477_v49 }
  0x1d   : > { %647 = vst.msk [vmem:[#allocation2 + $0x19] sm:$0x1] %vm635_vm6, %v1477_v49 }
  0x1e   : > { %648 = vst.msk [vmem:[#allocation2 + $0x29] sm:$0x1] %vm635_vm6, %v1477_v49 }
  0x1f   : > { %649 = vst.msk [vmem:[#allocation2 + $0x39] sm:$0x1] %vm635_vm6, %v1477_v49 }
  0x20   : > { %650 = vst.msk [vmem:[#allocation2 + $0x49] sm:$0x1] %vm635_vm6, %v1477_v49 }
  0x21   : > { %651 = vst.msk [vmem:[#allocation2 + $0x59] sm:$0x1] %vm635_vm6, %v1477_v49 }
  0x22   : > { %1352 = vmatmul.msk.bf16.gmra.mxu2 %vm316_vm0, %v306_v24  ;;  %652 = vst.msk [vmem:[#allocation2 + $0x69] sm:$0x1] %vm635_vm6, %v1477_v49 }
  0x23   : > { %1360 = vmatmul.msk.bf16.gmra.mxu3 %vm316_vm0, %v291_v21  ;;  %653 = vst.msk [vmem:[#allocation2 + $0x79] sm:$0x1] %vm635_vm6, %v1477_v49  ;;  %v665_v21 = vld [vmem:[#allocation2] sm:$0xff] }
  0x24   : > { %1358 = vmatmul.msk.bf16.gmra.mxu1 %vm316_vm0, %v289_v20  ;;  %654 = vst.msk [vmem:[#allocation2 + $0x89] sm:$0x1] %vm635_vm6, %v1477_v49  ;;  %v678_v20 = vld [vmem:[#allocation2 + $0x1] sm:$0xff] }
  0x25   : > { %1350 = vmatmul.msk.bf16.gmra.mxu0 %vm316_vm0, %v304_v27  ;;  %645 = vst.msk [vmem:[#allocation2 + $0x90] sm:$0x1] %vm635_vm6, %v1477_v49 }
  0x26   : > { %655 = vst.msk [vmem:[#allocation2 + $0x99] sm:$0x1] %vm635_vm6, %v1477_v49 }
  0x32   : > { %1375 = vmatmul.msk.bf16.vlgmr.msrb.gmra.mxu2 %vm316_vm0, %v414_v28 }
  0x33   : > { %1393 = vmatmul.msk.bf16.vlgmr.msrb.gmra.mxu3 %vm316_vm0, %v484_v29 }
  0x42   : > { %1376 = vmatmul.msk.bf16.gmra.mxu2 %vm316_vm0, %v415_v32 }
  0x43   : > { %1394 = vmatmul.msk.bf16.gmra.mxu3 %vm316_vm0, %v485_v33 }
  0x52   : > { %1377 = vmatmul.msk.bf16.gmra.mxu2 %vm316_vm0, %v416_v38 }
  0x53   : > { %1395 = vmatmul.msk.bf16.gmra.mxu3 %vm316_vm0, %v486_v39 }
  0x62   : > { %1378 = vmatmul.msk.bf16.gmra.mxu2 %vm316_vm0, %v417_v31 }
  0x63   : > { %1396 = vmatmul.msk.bf16.gmra.mxu3 %vm316_vm0, %v487_v35 }
  0x85   : > { %v559_v51 = vpop.permute.xlu1 %558 }
  0x86   : > { %v555_v40 = vpop.permute.xlu0 %554 }
  0x87   : > { %1397 = vmatmul.msk.bf16.vlgmr.msrb.gmra.mxu0 %vm562_vm2, %v555_v40 }
  0x8d   : > { %v561_v1 = vpop.permute.xlu1 %560 }
  0x8e   : > { %v557_v43 = vpop.permute.xlu0 %556 }
  0x91   : > { %v385_v56 = vpop.f32.mrf.mxu1 }
  0x92   : > { %v338_v57 = vpop.f32.mrf.mxu0 }
  0x93   : > { %v386_v0 = vadd.f32 %v385_v56, %v338_v57 }
  0x95   : > { %v1588_v44 = vpop.f32.mrf.mxu2 }
  0x96   : > { %v1590_v45 = vpop.f32.mrf.mxu3 }
  0x97   : > { %1398 = vmatmul.msk.bf16.gmra.mxu0 %vm562_vm2, %v557_v43  ;;  %v396_v50 = vadd.f32 %v1590_v45, %v1588_v44 }
  0x99   : > { %v387_v2 = vpop.f32.mrf.mxu1 }
  0x9a   : > { %v340_v3 = vpop.f32.mrf.mxu0 }
  0x9b   : > { %v388_v10 = vadd.f32 %v387_v2, %v340_v3  ;;  %v1425_v2 = vld [vmem:[%s1912_s5 + $0x14] sm:$0xf]  ;;  %v1430_v3 = vld [vmem:[%s1912_s5 + $0x18] sm:$0xf] }
  0x9d   : > { %v1593_v46 = vpop.f32.mrf.mxu2 }
  0x9e   : > { %v1595_v47 = vpop.f32.mrf.mxu3 }
  0xa1   : > { %v390_v16 = vpop.f32.mrf.mxu1 }
  0xa2   : > { %v343_v15 = vpop.f32.mrf.mxu0 }
  0xa3   : > { %v391_v18 = vadd.f32 %v390_v16, %v343_v15  ;;  %v1435_v16 = vld [vmem:[%s1912_s5 + $0x1c] sm:$0xf] }
  0xa5   : > { %v1609_v53 = vpop.f32.mrf.mxu2 }
  0xa6   : > { %v1613_v55 = vpop.f32.mrf.mxu3 }
  0xa7   : > { %1399 = vmatmul.msk.bf16.gmra.mxu0 %vm562_vm2, %v559_v51 }
  0xa9   : > { %v392_v35 = vpop.f32.mrf.mxu1 }
  0xaa   : > { %v345_v34 = vpop.f32.mrf.mxu0 }
  0xab   : > { %v393_v37 = vadd.f32 %v392_v35, %v345_v34 }
  0xad   : > { %v1626_v59 = vpop.f32.mrf.mxu2 }
  0xae   : > { %v1630_v61 = vpop.f32.mrf.mxu3 }
  0xaf   : > { %v403_v34 = vadd.f32 %v1630_v61, %v1626_v59 }
  0xb5   : > { %v448_v4 = vpop.f32.mrf.mxu2 }
  0xb6   : > { %v468_v5 = vadd.f32 %v448_v4, %v386_v0  ;;  %v518_v6 = vpop.f32.mrf.mxu3 }
  0xb7   : > { %1400 = vmatmul.msk.bf16.gmra.mxu0 %vm562_vm2, %v561_v1 }
  0xb8   : > { %v538_v8 = vadd.f32 %v518_v6, %v468_v5  ;;  %v1006_v5 = vsel %vm704_vm3, %v1425_v2, 0  ;;  %v1073_v6 = vsel %vm704_vm3, %v1430_v3, 0 }
  0xb9   : > { %1015 = vmatpush.bf16.msrb.mxu2 %v1006_v5  ;;  %1082 = vmatpush.bf16.msrb.mxu3 %v1073_v6 }
  0xba   : > { %v612_v9 = vadd.f32 %v1647_v7, %v538_v8  ;;  %v398_v8 = vadd.f32 %v1595_v47, %v1593_v46  ;;  %v401_v46 = vadd.f32 %v1613_v55, %v1609_v53  ;;  %v1440_v53 = vld [vmem:[%s1912_s5 + $0x20] sm:$0xf] }
  0xbc   : > { %v620_v11 = vmax.f32 %v612_v9, 0.0 }
  0xbd   : > { %v450_v12 = vpop.f32.mrf.mxu2 }
  0xbe   : > { %657 = vst.msk [vmem:[#allocation2 + $0x11] sm:$0xff] %vm628_vm4, %v620_v11  ;;  %v469_v13 = vadd.f32 %v450_v12, %v388_v10  ;;  %v520_v14 = vpop.f32.mrf.mxu3 }
  0xc0   : > { %v539_v17 = vadd.f32 %v520_v14, %v469_v13 }
  0xc2   : > { %v613_v19 = vadd.f32 %v1647_v7, %v539_v17  ;;  %v1139_v17 = vsel %vm704_vm3, %v1435_v16, 0 }
  0xc3   : > { %1148 = vmatpush.bf16.msrb.mxu0 %v1139_v17 }
  0xc4   : > { %v621_v23 = vmax.f32 %v613_v19, 0.0 }
  0xc5   : > { %v453_v24 = vpop.f32.mrf.mxu2  ;;  %v1653_v25 = vld [vmem:[#allocation2 + $0x11] sm:$0xff] }
  0xc6   : > { %v666_v26 = vld [vmem:[#allocation2 + $0x10] sm:$0xff]  ;;  %658 = vst.msk [vmem:[#allocation2 + $0x21] sm:$0xff] %vm628_vm4, %v621_v23  ;;  %v470_v28 = vadd.f32 %v453_v24, %v391_v18  ;;  %v523_v29 = vpop.f32.mrf.mxu3  ;;  %v686_v30 = vpack.c.bf16 %v1653_v25, %v678_v20 }
  0xc7   : > { %v1655_v27 = vld [vmem:[#allocation2 + $0x12] sm:$0xff]  ;;  %v673_v31 = vpack.c.bf16 %v666_v26, %v665_v21 }
  0xc8   : > { %v789_v32 = vpack.c.bf16 %v1655_v27, %v781_v22  ;;  %v540_v33 = vadd.f32 %v523_v29, %v470_v28  ;;  %1402 = vmatmul.msk.bf16.vlgmr.msrb.gmra.mxu1 %vm628_vm4, %v686_v30 }
  0xc9   : > { %1406 = vmatmul.msk.bf16.vlgmr.msra.gmra.mxu2 %vm628_vm4, %v673_v31 }
  0xca   : > { %1411 = vmatmul.msk.bf16.vlgmr.msra.gmra.mxu3 %vm628_vm4, %v789_v32  ;;  %v614_v36 = vadd.f32 %v1647_v7, %v540_v33  ;;  %v1205_v33 = vsel %vm704_vm3, %v1440_v53, 0 }
  0xcb   : > { %1214 = vmatpush.bf16.msrb.mxu1 %v1205_v33 }
  0xcc   : > { %v622_v38 = vmax.f32 %v614_v36, 0.0 }
  0xcd   : > { %v455_v39 = vpop.f32.mrf.mxu2  ;;  %v848_v40 = vld [vmem:[#allocation2 + $0x20] sm:$0xff] }
  0xce   : > { %659 = vst.msk [vmem:[#allocation2 + $0x31] sm:$0xff] %vm628_vm4, %v622_v38  ;;  %v471_v41 = vadd.f32 %v455_v39, %v393_v37  ;;  %v525_v42 = vpop.f32.mrf.mxu3  ;;  %v855_v43 = vpack.c.bf16 %v848_v40, %v666_v26  ;;  %v1669_v52 = vld [vmem:[#allocation2 + $0x21] sm:$0xff] }
  0xcf   : > { %v1671_v54 = vld [vmem:[#allocation2 + $0x22] sm:$0xff] }
  0xd0   : > { %v541_v48 = vadd.f32 %v525_v42, %v471_v41  ;;  %1416 = vmatmul.msk.bf16.vlgmr.msra.gmra.mxu0 %vm628_vm4, %v855_v43 }
  0xd2   : > { %v615_v49 = vadd.f32 %v1647_v7, %v541_v48 }
  0xd4   : > { %v623_v51 = vmax.f32 %v615_v49, 0.0 }
  0xd5   : > { %v458_v56 = vpop.f32.mrf.mxu2  ;;  %v1673_v57 = vld [vmem:[#allocation2 + $0x31] sm:$0xff] }
  0xd6   : > { %v668_v58 = vld [vmem:[#allocation2 + $0x30] sm:$0xff]  ;;  %660 = vst.msk [vmem:[#allocation2 + $0x41] sm:$0xff] %vm628_vm4, %v623_v51  ;;  %v472_v62 = vadd.f32 %v458_v56, %v396_v50  ;;  %v528_v63 = vpop.f32.mrf.mxu3  ;;  %v1680_v0 = vpack.c.bf16 %v1673_v57, %v1669_v52 }
  0xd7   : > { %v1675_v60 = vld [vmem:[#allocation2 + $0x32] sm:$0xff]  ;;  %v1682_v44 = vpack.c.bf16 %v668_v58, %v848_v40 }
  0xd8   : > { %v1686_v45 = vpack.c.bf16 %v1675_v60, %v1671_v54  ;;  %v542_v1 = vadd.f32 %v528_v63, %v472_v62  ;;  %1403 = vmatmul.msk.bf16.gmra.mxu1 %vm628_vm4, %v1680_v0 }
  0xd9   : > { %1407 = vmatmul.msk.bf16.gmra.mxu2 %vm628_vm4, %v1682_v44 }
  0xda   : > { %1412 = vmatmul.msk.bf16.gmra.mxu3 %vm628_vm4, %v1686_v45  ;;  %v616_v4 = vadd.f32 %v1647_v7, %v542_v1  ;;  %v987_v1 = vpack.c.bf16 %v1671_v54, %v1655_v27 }
  0xdc   : > { %v624_v9 = vmax.f32 %v616_v4, 0.0 }
  0xdd   : > { %v460_v10 = vpop.f32.mrf.mxu2  ;;  %v850_v11 = vld [vmem:[#allocation2 + $0x40] sm:$0xff] }
  0xde   : > { %661 = vst.msk [vmem:[#allocation2 + $0x51] sm:$0xff] %vm628_vm4, %v624_v9  ;;  %v473_v12 = vadd.f32 %v460_v10, %v398_v8  ;;  %v530_v13 = vpop.f32.mrf.mxu3  ;;  %v856_v14 = vpack.c.bf16 %v850_v11, %v668_v58  ;;  %v682_v19 = vld [vmem:[#allocation2 + $0x41] sm:$0xff]  ;;  %v1119_v9 = vld [vmem:[#allocation2 + $0x91] sm:$0xff] }
  0xdf   : > { %v785_v20 = vld [vmem:[#allocation2 + $0x42] sm:$0xff]  ;;  %v922_v3 = vpack.c.bf16 %v682_v19, %v1673_v57 }
  0xe0   : > { %v543_v15 = vadd.f32 %v530_v13, %v473_v12  ;;  %1417 = vmatmul.msk.bf16.gmra.mxu0 %vm628_vm4, %v856_v14  ;;  %v988_v4 = vpack.c.bf16 %v785_v20, %v1675_v60 }
  0xe2   : > { %v617_v18 = vadd.f32 %v1647_v7, %v543_v15 }
  0xe4   : > { %v625_v47 = vmax.f32 %v617_v18, 0.0 }
  0xe5   : > { %v463_v21 = vpop.f32.mrf.mxu2  ;;  %v683_v22 = vld [vmem:[#allocation2 + $0x51] sm:$0xff] }
  0xe6   : > { %v670_v23 = vld [vmem:[#allocation2 + $0x50] sm:$0xff]  ;;  %662 = vst.msk [vmem:[#allocation2 + $0x61] sm:$0xff] %vm628_vm4, %v625_v47  ;;  %v474_v26 = vadd.f32 %v463_v21, %v401_v46  ;;  %v533_v28 = vpop.f32.mrf.mxu3  ;;  %v688_v29 = vpack.c.bf16 %v683_v22, %v682_v19 }
  0xe7   : > { %v786_v24 = vld [vmem:[#allocation2 + $0x52] sm:$0xff]  ;;  %v675_v30 = vpack.c.bf16 %v670_v23, %v850_v11 }
  0xe8   : > { %v1715_v31 = vpack.c.bf16 %v786_v24, %v785_v20  ;;  %v544_v32 = vadd.f32 %v533_v28, %v474_v26  ;;  %1404 = vmatmul.msk.bf16.gmra.mxu1 %vm628_vm4, %v688_v29  ;;  %v1185_v26 = vld [vmem:[#allocation2 + $0x92] sm:$0xff] }
  0xe9   : > { %1408 = vmatmul.msk.bf16.gmra.mxu2 %vm628_vm4, %v675_v30 }
  0xea   : > { %1413 = vmatmul.msk.bf16.gmra.mxu3 %vm628_vm4, %v1715_v31  ;;  %v618_v55 = vadd.f32 %v1647_v7, %v544_v32 }
  0xec   : > { %v626_v35 = vmax.f32 %v618_v55, 0.0 }
  0xed   : > { %v465_v36 = vpop.f32.mrf.mxu2  ;;  %v852_v37 = vld [vmem:[#allocation2 + $0x60] sm:$0xff] }
  0xee   : > { %663 = vst.msk [vmem:[#allocation2 + $0x71] sm:$0xff] %vm628_vm4, %v626_v35  ;;  %v475_v38 = vadd.f32 %v465_v36, %v403_v34  ;;  %v857_v39 = vpack.c.bf16 %v852_v37, %v670_v23  ;;  %v535_v40 = vpop.f32.mrf.mxu3  ;;  %v684_v48 = vld [vmem:[#allocation2 + $0x61] sm:$0xff] }
  0xef   : > { %v787_v49 = vld [vmem:[#allocation2 + $0x62] sm:$0xff]  ;;  %v923_v27 = vpack.c.bf16 %v684_v48, %v683_v22 }
  0xf0   : > { %v545_v41 = vadd.f32 %v535_v40, %v475_v38  ;;  %1418 = vmatmul.msk.bf16.gmra.mxu0 %vm628_vm4, %v857_v39 }
  0xf2   : > { %v619_v42 = vadd.f32 %v1647_v7, %v545_v41  ;;  %v921_v7 = vpack.c.bf16 %v1669_v52, %v1653_v25  ;;  %v989_v52 = vpack.c.bf16 %v787_v49, %v786_v24 }
  0xf4   : > { %v627_v43 = vmax.f32 %v619_v42, 0.0 }
  0xf5   : > { %v685_v50 = vld [vmem:[#allocation2 + $0x71] sm:$0xff] }
  0xf6   : > { %v672_v51 = vld [vmem:[#allocation2 + $0x70] sm:$0xff]  ;;  %664 = vst.msk [vmem:[#allocation2 + $0x81] sm:$0xff] %vm628_vm4, %v627_v43  ;;  %v689_v59 = vpack.c.bf16 %v685_v50, %v684_v48 }
  0xf7   : > { %v788_v56 = vld [vmem:[#allocation2 + $0x72] sm:$0xff]  ;;  %v676_v61 = vpack.c.bf16 %v672_v51, %v852_v37 }
  0xf8   : > { %v792_v58 = vpack.c.bf16 %v788_v56, %v787_v49  ;;  %1405 = vmatmul.msk.bf16.gmra.mxu1 %vm628_vm4, %v689_v59 }
  0xf9   : > { %1409 = vmatmul.msk.bf16.gmra.mxu2 %vm628_vm4, %v676_v61 }
  0xfa   : > { %1414 = vmatmul.msk.bf16.gmra.mxu3 %vm628_vm4, %v792_v58 }
  0xfd   : > { %v854_v62 = vld [vmem:[#allocation2 + $0x80] sm:$0xff] }
  0xfe   : > { %v858_v63 = vpack.c.bf16 %v854_v62, %v672_v51  ;;  %v920_v60 = vld [vmem:[#allocation2 + $0x81] sm:$0xff] }
  0xff   : > { %v924_v5 = vpack.c.bf16 %v920_v60, %v685_v50  ;;  %v1123_v11 = vpack.c.bf16 %v1119_v9, %v920_v60 }
 0x100   : > { %1419 = vmatmul.msk.bf16.gmra.mxu0 %vm628_vm4, %v858_v63 }
 0x104   : > { %v1746_v2 = vpop.f32.mrf.mxu0 }
 0x108   : > { %1421 = vmatmul.msk.bf16.vlgmr.msra.gmra.mxu1 %vm628_vm4, %v921_v7 }
 0x109   : > { %1426 = vmatmul.msk.bf16.vlgmr.msrb.gmra.mxu2 %vm628_vm4, %v987_v1 }
 0x10a   : > { %1431 = vmatmul.msk.bf16.vlgmr.msrb.gmra.mxu3 %vm628_vm4, %v1682_v44  ;;  %v1053_v44 = vld [vmem:[#allocation2 + $0x90] sm:$0xff] }
 0x10b   : > { %v1057_v8 = vpack.c.bf16 %v1053_v44, %v854_v62 }
 0x10c   : > { %v1753_v25 = vpop.f32.mrf.mxu0 }
 0x110   : > { %1436 = vmatmul.msk.bf16.vlgmr.msrb.gmra.mxu0 %vm628_vm4, %v1680_v0  ;;  %v986_v0 = vld [vmem:[#allocation2 + $0x82] sm:$0xff] }
 0x111   : > { %v990_v6 = vpack.c.bf16 %v986_v0, %v788_v56 }
 0x114   : > { %v1756_v54 = vpop.f32.mrf.mxu0 }
 0x118   : > { %1422 = vmatmul.msk.bf16.gmra.mxu1 %vm628_vm4, %v922_v3 }
 0x119   : > { %1427 = vmatmul.msk.bf16.gmra.mxu2 %vm628_vm4, %v988_v4 }
 0x11a   : > { %1432 = vmatmul.msk.bf16.gmra.mxu3 %vm628_vm4, %v675_v30  ;;  %v1189_v30 = vpack.c.bf16 %v1185_v26, %v986_v0 }
 0x11c   : > { %v1762_v57 = vpop.f32.mrf.mxu0 }
 0x120   : > { %1437 = vmatmul.msk.bf16.gmra.mxu0 %vm628_vm4, %v688_v29 }
 0x124   : > { %v1767_v10 = vpop.f32.mrf.mxu0 }
 0x128   : > { %1423 = vmatmul.msk.bf16.gmra.mxu1 %vm628_vm4, %v923_v27 }
 0x129   : > { %1428 = vmatmul.msk.bf16.gmra.mxu2 %vm628_vm4, %v989_v52 }
 0x12a   : > { %1433 = vmatmul.msk.bf16.gmra.mxu3 %vm628_vm4, %v676_v61 }
 0x12c   : > { %v1770_v13 = vpop.f32.mrf.mxu0 }
 0x130   : > { %1438 = vmatmul.msk.bf16.gmra.mxu0 %vm628_vm4, %v689_v59 }
 0x134   : > { %v1774_v15 = vpop.f32.mrf.mxu0 }
 0x138   : > { %1424 = vmatmul.msk.bf16.gmra.mxu1 %vm628_vm4, %v924_v5 }
 0x139   : > { %1429 = vmatmul.msk.bf16.gmra.mxu2 %vm628_vm4, %v990_v6 }
 0x13a   : > { %1434 = vmatmul.msk.bf16.gmra.mxu3 %vm628_vm4, %v1057_v8 }
 0x13c   : > { %v1778_v17 = vpop.f32.mrf.mxu0 }
 0x140   : > { %1439 = vmatmul.msk.bf16.gmra.mxu0 %vm628_vm4, %v1123_v11 }
 0x145   : > { %v717_v12 = vpop.f32.mrf.mxu1 }
 0x148   : > { %1441 = vmatmul.msk.bf16.vlgmr.msrb.gmra.mxu1 %vm628_vm4, %v1686_v45 }
 0x14c   : > { %v761_v18 = vpop.f32.mrf.mxu2 }
 0x14d   : > { %v719_v14 = vpop.f32.mrf.mxu1  ;;  %v819_v47 = vpop.f32.mrf.mxu3  ;;  %v762_v63 = vadd.f32 %v761_v18, %v717_v12 }
 0x14e   : > { %v885_v19 = vpop.f32.mrf.mxu0 }
 0x14f   : > { %v839_v1 = vadd.f32 %v819_v47, %v762_v63  ;;  %v1829_v47 = vld [vmem:[%s1911_s4] ss:$0 sm:$0xff] }
 0x151   : > { %v905_v52 = vadd.f32 %v885_v19, %v839_v1 }
 0x154   : > { %v763_v20 = vpop.f32.mrf.mxu2 }
 0x155   : > { %v722_v16 = vpop.f32.mrf.mxu1  ;;  %v821_v45 = vpop.f32.mrf.mxu3  ;;  %v764_v60 = vadd.f32 %v763_v20, %v719_v14 }
 0x156   : > { %v887_v23 = vpop.f32.mrf.mxu0 }
 0x157   : > { %v840_v5 = vadd.f32 %v821_v45, %v764_v60  ;;  %v1834_v45 = vld [vmem:[%s1913_s6] ss:$0 sm:$0xff] }
 0x158   : > { %1442 = vmatmul.msk.bf16.gmra.mxu1 %vm628_vm4, %v1715_v31 }
 0x159   : > { %v906_v26 = vadd.f32 %v887_v23, %v840_v5 }
 0x15c   : > { %v766_v24 = vpop.f32.mrf.mxu2 }
 0x15d   : > { %v1780_v46 = vpop.f32.mrf.mxu1  ;;  %v824_v28 = vpop.f32.mrf.mxu3 }
 0x15e   : > { %v890_v31 = vpop.f32.mrf.mxu0 }
 0x164   : > { %v768_v32 = vpop.f32.mrf.mxu2 }
 0x165   : > { %v1782_v21 = vpop.f32.mrf.mxu1  ;;  %v826_v55 = vpop.f32.mrf.mxu3 }
 0x166   : > { %v1792_v33 = vpop.f32.mrf.mxu0 }
 0x168   : > { %1443 = vmatmul.msk.bf16.gmra.mxu1 %vm628_vm4, %v792_v58 }
 0x16c   : > { %v1794_v34 = vpop.f32.mrf.mxu2 }
 0x16d   : > { %v1785_v22 = vpop.f32.mrf.mxu1  ;;  %v1796_v36 = vpop.f32.mrf.mxu3  ;;  %v772_v5 = vadd.f32 %v1794_v34, %v1782_v21  ;;  %v594_v21 = vadd.f32 %v1829_v47, %v1756_v54 }
 0x16e   : > { %v1798_v37 = vpop.f32.mrf.mxu0 }
 0x174   : > { %v1800_v38 = vpop.f32.mrf.mxu2 }
 0x175   : > { %v1787_v29 = vpop.f32.mrf.mxu1  ;;  %v1802_v40 = vpop.f32.mrf.mxu3  ;;  %v774_v34 = vadd.f32 %v1800_v38, %v1785_v22  ;;  %v596_v22 = vadd.f32 %v1829_v47, %v1762_v57 }
 0x176   : > { %v1804_v42 = vpop.f32.mrf.mxu0 }
 0x178   : > { %1444 = vmatmul.msk.bf16.gmra.mxu1 %vm628_vm4, %v1189_v30  ;;  %v767_v30 = vadd.f32 %v766_v24, %v722_v16  ;;  %v589_v16 = vadd.f32 %v1829_v47, %v1746_v2 }
 0x17a   : > { %v841_v19 = vadd.f32 %v824_v28, %v767_v30 }
 0x17c   : > { %v1806_v43 = vpop.f32.mrf.mxu2  ;;  %v907_v24 = vadd.f32 %v890_v31, %v841_v19 }
 0x17d   : > { %v1790_v53 = vpop.f32.mrf.mxu1  ;;  %v1808_v48 = vpop.f32.mrf.mxu3 }
 0x17e   : > { %v1810_v50 = vpop.f32.mrf.mxu0 }
 0x184   : > { %v1812_v51 = vpop.f32.mrf.mxu2 }
 0x185   : > { %v951_v35 = vpop.f32.mrf.mxu1  ;;  %v1816_v59 = vpop.f32.mrf.mxu3 }
 0x186   : > { %v1818_v61 = vpop.f32.mrf.mxu0  ;;  %v971_v0 = vadd.f32 %v951_v35, %v905_v52 }
 0x18c   : > { %v1017_v58 = vpop.f32.mrf.mxu2 }
 0x18d   : > { %v953_v39 = vpop.f32.mrf.mxu1  ;;  %v1084_v7 = vpop.f32.mrf.mxu3  ;;  %v1037_v6 = vadd.f32 %v1017_v58, %v971_v0 }
 0x18e   : > { %v1150_v3 = vpop.f32.mrf.mxu0  ;;  %v972_v18 = vadd.f32 %v953_v39, %v906_v26  ;;  %v769_v39 = vadd.f32 %v768_v32, %v1780_v46  ;;  %v591_v32 = vadd.f32 %v1829_v47, %v1753_v25 }
 0x18f   : > { %v1104_v12 = vadd.f32 %v1084_v7, %v1037_v6 }
 0x190   : > { %v842_v52 = vadd.f32 %v826_v55, %v769_v39 }
 0x191   : > { %v1170_v14 = vadd.f32 %v1150_v3, %v1104_v12  ;;  %v843_v12 = vadd.f32 %v1796_v36, %v772_v5 }
 0x194   : > { %v1019_v4 = vpop.f32.mrf.mxu2 }
 0x195   : > { %v956_v41 = vpop.f32.mrf.mxu1  ;;  %v1086_v44 = vpop.f32.mrf.mxu3  ;;  %v1038_v20 = vadd.f32 %v1019_v4, %v972_v18 }
 0x196   : > { %v1152_v9 = vpop.f32.mrf.mxu0  ;;  %v973_v3 = vadd.f32 %v956_v41, %v907_v24 }
 0x197   : > { %v1105_v63 = vadd.f32 %v1086_v44, %v1038_v20  ;;  %v908_v44 = vadd.f32 %v1792_v33, %v842_v52  ;;  %v909_v33 = vadd.f32 %v1798_v37, %v843_v12 }
 0x199   : > { %v1171_v60 = vadd.f32 %v1152_v9, %v1105_v63 }
 0x19c   : > { %v1022_v11 = vpop.f32.mrf.mxu2 }
 0x19d   : > { %v958_v49 = vpop.f32.mrf.mxu1  ;;  %v1089_v35 = vpop.f32.mrf.mxu3  ;;  %v1039_v2 = vadd.f32 %v1022_v11, %v973_v3 }
 0x19e   : > { %v1155_v7 = vpop.f32.mrf.mxu0  ;;  %v974_v9 = vadd.f32 %v958_v49, %v908_v44 }
 0x19f   : > { %v1106_v6 = vadd.f32 %v1089_v35, %v1039_v2 }
 0x1a1   : > { %v1172_v18 = vadd.f32 %v1155_v7, %v1106_v6 }
 0x1a4   : > { %v1024_v1 = vpop.f32.mrf.mxu2 }
 0x1a5   : > { %v1814_v56 = vpop.f32.mrf.mxu1  ;;  %v1091_v41 = vpop.f32.mrf.mxu3  ;;  %v1040_v19 = vadd.f32 %v1024_v1, %v974_v9 }
 0x1a6   : > { %v1157_v11 = vpop.f32.mrf.mxu0 }
 0x1a7   : > { %v1107_v49 = vadd.f32 %v1091_v41, %v1040_v19 }
 0x1a9   : > { %v1173_v24 = vadd.f32 %v1157_v11, %v1107_v49 }
 0x1ac   : > { %v1027_v30 = vpop.f32.mrf.mxu2 }
 0x1ad   : > { %v1820_v62 = vpop.f32.mrf.mxu1  ;;  %v1094_v36 = vpop.f32.mrf.mxu3 }
 0x1ae   : > { %v1160_v63 = vpop.f32.mrf.mxu0 }
 0x1b5   : > { %v1822_v27 = vpop.f32.mrf.mxu1  ;;  %v1096_v52 = vpop.f32.mrf.mxu3 }
 0x1bd   : > { %v1824_v8 = vpop.f32.mrf.mxu1 }
 0x1c5   : > { %v1216_v58 = vpop.f32.mrf.mxu1 }
 0x1c6   : > { %v1236_v23 = vadd.f32 %v1216_v58, %v1170_v14  ;;  %v975_v58 = vadd.f32 %v1814_v56, %v909_v33  ;;  %v777_v56 = vadd.f32 %v1806_v43, %v1787_v29  ;;  %v599_v29 = vadd.f32 %v1829_v47, %v1767_v10 }
 0x1c8   : > { %v1248_v28 = vadd.f32 %v1834_v45, %v1236_v23  ;;  %v1041_v39 = vadd.f32 %v1027_v30, %v975_v58 }
 0x1ca   : > { %v1256_v4 = vadd.f32 %v1248_v28, %v589_v16  ;;  %v844_v16 = vadd.f32 %v1802_v40, %v774_v34  ;;  %v1029_v28 = vpop.f32.mrf.mxu2  ;;  %v1108_v1 = vadd.f32 %v1094_v36, %v1041_v39 }
 0x1cc   : > { %v1264_v31 = vmax.f32 %v1256_v4, 0.0  ;;  %v910_v38 = vadd.f32 %v1804_v42, %v844_v16  ;;  %v1174_v2 = vadd.f32 %v1160_v63, %v1108_v1  ;;  %v1162_v42 = vpop.f32.mrf.mxu0 }
 0x1cd   : > { %v1218_v0 = vpop.f32.mrf.mxu1 }
 0x1ce   : > { %1272 = vst.msk [vmem:[%s1844_s26] sm:$0xff] %vm628_vm4, %v1264_v31  ;;  %v1237_v46 = vadd.f32 %v1218_v0, %v1171_v60  ;;  %v976_v3 = vadd.f32 %v1820_v62, %v910_v38  ;;  %v845_v60 = vadd.f32 %v1808_v48, %v777_v56  ;;  %v779_v62 = vadd.f32 %v1812_v51, %v1790_v53 }
 0x1cf   : > { %v601_v53 = vadd.f32 %v1829_v47, %v1770_v13 }
 0x1d0   : > { %v1249_v55 = vadd.f32 %v1834_v45, %v1237_v46  ;;  %v1042_v31 = vadd.f32 %v1029_v28, %v976_v3  ;;  %v846_v6 = vadd.f32 %v1816_v59, %v779_v62 }
 0x1d2   : > { %v1257_v26 = vadd.f32 %v1249_v55, %v591_v32  ;;  %v1032_v43 = vpop.f32.mrf.mxu2  ;;  %v911_v32 = vadd.f32 %v1810_v50, %v845_v60  ;;  %v1109_v41 = vadd.f32 %v1096_v52, %v1042_v31  ;;  %v912_v51 = vadd.f32 %v1818_v61, %v846_v6 }
 0x1d3   : > { %v604_v61 = vadd.f32 %v1829_v47, %v1774_v15 }
 0x1d4   : > { %v1265_v14 = vmax.f32 %v1257_v26, 0.0  ;;  %v977_v44 = vadd.f32 %v1822_v27, %v911_v32  ;;  %v1175_v55 = vadd.f32 %v1162_v42, %v1109_v41  ;;  %v1099_v26 = vpop.f32.mrf.mxu3  ;;  %v1165_v12 = vpop.f32.mrf.mxu0  ;;  %v978_v59 = vadd.f32 %v1824_v8, %v912_v51 }
 0x1d5   : > { %v1221_v20 = vpop.f32.mrf.mxu1 }
 0x1d6   : > { %1273 = vst.msk [vmem:[%s1844_s26 + $0x8] sm:$0xff] %vm628_vm4, %v1265_v14  ;;  %v1238_v25 = vadd.f32 %v1221_v20, %v1172_v18  ;;  %v1043_v9 = vadd.f32 %v1032_v43, %v977_v44 }
 0x1d8   : > { %v1250_v35 = vadd.f32 %v1834_v45, %v1238_v25  ;;  %v1110_v30 = vadd.f32 %v1099_v26, %v1043_v9 }
 0x1da   : > { %v1258_v23 = vadd.f32 %v1250_v35, %v594_v21  ;;  %v1034_v18 = vpop.f32.mrf.mxu2  ;;  %v1176_v14 = vadd.f32 %v1165_v12, %v1110_v30 }
 0x1db   : > { %v1044_v20 = vadd.f32 %v1034_v18, %v978_v59 }
 0x1dc   : > { %v1266_v7 = vmax.f32 %v1258_v23, 0.0  ;;  %v1101_v13 = vpop.f32.mrf.mxu3  ;;  %v1167_v36 = vpop.f32.mrf.mxu0 }
 0x1dd   : > { %v1223_v54 = vpop.f32.mrf.mxu1  ;;  %v1111_v34 = vadd.f32 %v1101_v13, %v1044_v20 }
 0x1de   : > { %1274 = vst.msk [vmem:[%s1844_s26 + $0x10] sm:$0xff] %vm628_vm4, %v1266_v7  ;;  %v1239_v37 = vadd.f32 %v1223_v54, %v1173_v24  ;;  %v606_v24 = vadd.f32 %v1829_v47, %v1778_v17 }
 0x1df   : > { %v1177_v8 = vadd.f32 %v1167_v36, %v1111_v34 }
 0x1e0   : > { %v1251_v40 = vadd.f32 %v1834_v45, %v1239_v37 }
 0x1e2   : > { %v1259_v4 = vadd.f32 %v1251_v40, %v596_v22 }
 0x1e4   : > { %v1267_v0 = vmax.f32 %v1259_v4, 0.0 }
 0x1e5   : > { %v1226_v46 = vpop.f32.mrf.mxu1 }
 0x1e6   : > { %1275 = vst.msk [vmem:[%s1844_s26 + $0x18] sm:$0xff] %vm628_vm4, %v1267_v0  ;;  %v1240_v57 = vadd.f32 %v1226_v46, %v1174_v2 }
 0x1e8   : > { %v1252_v48 = vadd.f32 %v1834_v45, %v1240_v57 }
 0x1ea   : > { %v1260_v5 = vadd.f32 %v1252_v48, %v599_v29 }
 0x1ec   : > { %v1268_v11 = vmax.f32 %v1260_v5, 0.0 }
 0x1ed   : > { %v1228_v10 = vpop.f32.mrf.mxu1 }
 0x1ee   : > { %1276 = vst.msk [vmem:[%s1844_s26 + $0x20] sm:$0xff] %vm628_vm4, %v1268_v11  ;;  %v1241_v50 = vadd.f32 %v1228_v10, %v1175_v55 }
 0x1f0   : > { %v1253_v27 = vadd.f32 %v1834_v45, %v1241_v50 }
 0x1f2   : > { %v1261_v19 = vadd.f32 %v1253_v27, %v601_v53 }
 0x1f4   : > { %v1269_v25 = vmax.f32 %v1261_v19, 0.0 }
 0x1f5   : > { %v1231_v21 = vpop.f32.mrf.mxu1 }
 0x1f6   : > { %1277 = vst.msk [vmem:[%s1844_s26 + $0x28] sm:$0xff] %vm628_vm4, %v1269_v25  ;;  %v1242_v33 = vadd.f32 %v1231_v21, %v1176_v14 }
 0x1f8   : > { %v1254_v49 = vadd.f32 %v1834_v45, %v1242_v33 }
 0x1fa   : > { %v1262_v35 = vadd.f32 %v1254_v49, %v604_v61 }
 0x1fc   : > { %v1270_v58 = vmax.f32 %v1262_v35, 0.0 }
 0x1fd   : > { %v1233_v23 = vpop.f32.mrf.mxu1 }
 0x1fe   : > { %1278 = vst.msk [vmem:[%s1844_s26 + $0x30] sm:$0xff] %vm628_vm4, %v1270_v58  ;;  %v1243_v16 = vadd.f32 %v1233_v23, %v1177_v8 }
 0x200   : > { %v1255_v39 = vadd.f32 %v1834_v45, %v1243_v16 }
 0x202   : > { %v1263_v63 = vadd.f32 %v1255_v39, %v606_v24 }
 0x204   : > { %v1271_v7 = vmax.f32 %v1263_v63, 0.0 }
 0x206   : > { %1279 = vst.msk [vmem:[%s1844_s26 + $0x38] sm:$0xff] %vm628_vm4, %v1271_v7 }
 0x207 PF: > { %s17_s24 = sadd.s32 1, %s1474_s24  }
 0x208   : > { %p14_p4 = scmp.ge.s32.totalorder %s17_s24, 4  }
 0x20a   :  { %16 = sbr.rel (!%p14_p4) target bundleno = 1 (0x1), region = 93 }

</bundles_post_ra>
